<compile_context>
chip_gen: v7x
topology: tpu7x:2x2x1
jax: 0.10.0
libtpu: 0.0.40
codegen_flags: <defaults>
</compile_context>

<pallas_src>
import math
from functools import partial

import numpy as np
import jax
import jax.numpy as jnp
from jax.experimental import pallas as pl
from jax.experimental.pallas import tpu as pltpu

EPSILON = 1e-5
LANES = 128
SUBLANES = 8


def _entropy_kernel(w_ref, o_ref, *, scale):
    # w_ref: [R, 128] f32 in VMEM (lane-dense, zero padded) -- one reduce,
    # one multiply by a trace-time constant.
    w = w_ref[...]
    s = jnp.sum(w * jnp.log(w + EPSILON))
    o_ref[0, 0] = -s * scale


def entropy_group_pallas(w_rows: jax.Array) -> jax.Array:
    """w_rows: [M, D] float32 of gathered group-projection rows -> scalar loss."""
    M, D = w_rows.shape
    # Exact algebraic collapse: mean_rows( -sum_d w*log(w+eps) / log(D) )
    #                         = -sum_all(w*log(w+eps)) / (M * log(D))
    scale = 1.0 / (M * math.log(D))

    # Flatten and zero-pad to a lane-dense (R, 128) block, R a multiple of 8.
    n = M * D
    n_rows = max(SUBLANES, pl.cdiv(n, LANES))
    n_rows = ((n_rows + SUBLANES - 1) // SUBLANES) * SUBLANES
    padded_len = n_rows * LANES
    flat = jnp.pad(w_rows.reshape(-1), (0, padded_len - n))   # zeros are exact
    w_padded = flat.reshape(n_rows, LANES)

    out = pl.pallas_call(
        partial(_entropy_kernel, scale=scale),
        out_shape=jax.ShapeDtypeStruct((1, 1), jnp.float32),
        in_specs=[pl.BlockSpec(memory_space=pltpu.MemorySpace.VMEM)],
        out_specs=pl.BlockSpec(memory_space=pltpu.MemorySpace.SMEM),
    )(w_padded)
    return out[0, 0]


# ---------------------------------------------------------------------------
# Deterministic synthetic "ppnet" (shapes implied by the module's forward).
# ---------------------------------------------------------------------------
def build_ppnet(key,
                num_classes: int = 4,
                num_groups: int = 4,
                num_prototypes: int = 16,
                proj_dim: int = 16,
                num_projections: int = 2):
    # prototype_class_identity: [num_prototypes, num_classes]; class 3 gets no
    # prototypes so the `continue` branch is exercised.
    proto_ci = np.zeros((num_prototypes, num_classes), dtype=np.float32)
    proto_per_class = [6, 5, 5, 0]
    row = 0
    for c, n in enumerate(proto_per_class):
        proto_ci[row:row + n, c] = 1.0
        row += n

    # group_class_identity: [num_projections * num_groups, num_classes]
    # classes 0,1 -> projection 0 ; classes 2,3 -> projection 1
    group_ci = np.zeros((num_projections * num_groups, num_classes), dtype=np.float32)
    for c in range(num_classes):
        proj = 0 if c < 2 else 1
        group_ci[proj * num_groups + (c % num_groups), c] = 1.0

    # group_projection[p].weight : [num_groups, proj_dim]; softmax rows so the
    # entropy of a probability-like row is well defined.
    keys = jax.random.split(key, num_projections)
    group_projection = []
    for p in range(num_projections):
        w = jax.random.normal(keys[p], (num_groups, proj_dim), dtype=jnp.float32)
        w = jax.nn.softmax(w, axis=-1)
        group_projection.append(np.asarray(w))

    return dict(
        num_classes=num_classes,
        num_groups=num_groups,
        prototype_class_identity=proto_ci,
        group_class_identity=group_ci,
        group_projection=group_projection,
    )


def entropy_group_forward(ppnet) -> jax.Array:
    """Mirrors EntropyGroup.forward: static row selection, on-device gather +
    Pallas entropy reduction (jitted)."""
    # Static selection on fixed identity buffers (the original uses .item()).
    row_ids = []
    for cls_i in range(ppnet["num_classes"]):
        if ppnet["prototype_class_identity"][:, cls_i].sum() == 0:
            continue
        id_proj = int(np.argmax(ppnet["group_class_identity"][:, cls_i])) // ppnet["num_groups"]
        for group in range(ppnet["num_groups"]):
            row_ids.append(id_proj * ppnet["num_groups"] + group)
    row_ids = jnp.asarray(np.asarray(row_ids, dtype=np.int32))          # [M]

    # [num_projections, num_groups, D] -> [num_projections*num_groups, D]
    all_w = jnp.asarray(np.stack(ppnet["group_projection"], axis=0), dtype=jnp.float32)
    all_w = all_w.reshape(-1, all_w.shape[-1])

    @jax.jit
    def run(all_w, row_ids):
        w_rows = jnp.take(all_w, row_ids, axis=0)                       # [M, D]
        return entropy_group_pallas(w_rows)

    return run(all_w, row_ids)


def entropy_group_reference(ppnet) -> float:
    """Pure-NumPy reference for correctness checking."""
    losses = []
    for cls_i in range(ppnet["num_classes"]):
        if ppnet["prototype_class_identity"][:, cls_i].sum() == 0:
            continue
        id_proj = int(np.argmax(ppnet["group_class_identity"][:, cls_i])) // ppnet["num_groups"]
        matrix_weight = ppnet["group_projection"][id_proj]
        for group in range(ppnet["num_groups"]):
            w = matrix_weight[group]
            losses.append(-np.sum(w * np.log(w + EPSILON)) / np.log(w.shape[0]))
    return float(np.mean(np.asarray(losses)))


if __name__ == "__main__":
    key = jax.random.PRNGKey(0)
    ppnet = build_ppnet(key)

    out = entropy_group_forward(ppnet)
    out = jax.block_until_ready(out)

    ref = entropy_group_reference(ppnet)
    np.testing.assert_allclose(np.asarray(out), ref, rtol=1e-5, atol=1e-5)

    print("KERNEL_OK")
</pallas_src>

<mosaic_0001>
module attributes {stable_mosaic.version = 11 : i64} {
  func.func @_entropy_kernel(%arg0: memref<8x128xf32, #tpu.memory_space<vmem>>, %arg1: memref<1x1xf32, #tpu.memory_space<smem>>) attributes {dimension_semantics = [], scalar_prefetch = 0 : i64, scratch_operands = 0 : i64, tpu.core_type = #tpu.core_type<tc>} {
    %c0 = arith.constant 0 : index
    %c0_0 = arith.constant 0 : index
    %0 = vector.load %arg0[%c0, %c0_0] : memref<8x128xf32, #tpu.memory_space<vmem>>, vector<8x128xf32>
    %cst = arith.constant 9.99999974E-6 : f32
    %1 = vector.broadcast %cst : f32 to vector<8x128xf32>
    %2 = arith.addf %0, %1 : vector<8x128xf32>
    %3 = math.log %2 : vector<8x128xf32>
    %4 = arith.mulf %0, %3 : vector<8x128xf32>
    %5 = vector.shape_cast %4 : vector<8x128xf32> to vector<1x8x128xf32>
    %cst_1 = arith.constant dense<0.000000e+00> : vector<1xf32>
    %6 = vector.multi_reduction <add>, %5, %cst_1 [1, 2] : vector<1x8x128xf32> to vector<1xf32>
    %7 = vector.shape_cast %6 : vector<1xf32> to vector<1x1x1xf32>
    %8 = vector.extract %7[0, 0, 0] : f32 from vector<1x1x1xf32>
    %cst_2 = arith.constant 0.000000e+00 : f32
    %9 = arith.subf %cst_2, %8 : f32
    %cst_3 = arith.constant 0.0300561469 : f32
    %10 = arith.mulf %9, %cst_3 : f32
    %c0_4 = arith.constant 0 : index
    %c0_5 = arith.constant 0 : index
    %11 = memref.load %arg1[%c0_4, %c0_5] : memref<1x1xf32, #tpu.memory_space<smem>>
    memref.store %10, %arg1[%c0_4, %c0_5] : memref<1x1xf32, #tpu.memory_space<smem>>
    return
  }
}

</mosaic_0001>

<bundles_post_ra>
// kernel: run.1
= control target key start
LH: loop header
LB: loop body
LE: loop exit
PB: predicated region body
PF: predicated region fallthrough
CT: control target
= control target key end

     0   :  { %s83_s0 = inlined_call_operand.vmem [shape: f32[8,128], index: 0, kind: input, shape index: {}]   ;;  %s84_s1 = inlined_call_operand.hbm [shape: f32[1,1], index: 1, kind: output, shape index: {}]  }
   0x1   :  { %v9_v0 = vld [vmem:[%s83_s0] sm:$0xff] }
   0x2   :  { %6 = vsyncpa [#allocation3], 0  ;;  %v10_v1 = vadd.f32 1e-05, %v9_v0  ;;  %s45_s12 = scalar_lea.hbm %s84_s1, 16 }
   0x3   :  { %p46_p0 = scmp.ne.s32.totalorder %s84_s1, %s45_s12  ;;  %p49_p1 = scmp.lt.u32.totalorder %s45_s12, %s84_s1 }
   0x4   :  { %43 = vlog2.f32 %v10_v1 }
   0x5   :  { %p51_p2 = pnand %p49_p1, %p46_p0 }
   0xe   :  { %v44_v2 = vpop.eup %43 }
   0xf   :  { %v12_v3 = vmul.f32 0.6931472, %v44_v2 }
  0x11   :  { %v13_v4 = vmul.f32 %v12_v3, %v9_v0 }
  0x13   :  { %14 = vadd.xlane.f32.xlu0 %v13_v4 }
  0xa0   :  { %v15_v5 = vpop.xlane.xlu0 %14 }
  0xa1   :  { %v16_v6 = vrot.slane %v15_v5, 4 }
  0xa3   :  { %v17_v7 = vadd.f32 %v16_v6, %v15_v5 }
  0xa5   :  { %v18_v8 = vrot.slane %v17_v7, 2 }
  0xa7   :  { %v19_v9 = vadd.f32 %v18_v8, %v17_v7 }
  0xa9   :  { %v20_v10 = vrot.slane %v19_v9, 1 }
  0xab   :  { %v21_v11 = vadd.f32 %v20_v10, %v19_v9 }
  0xad   :  { %40 = vpush %v21_v11 }
  0xde   :  { %s41_s8 = spop %40 }
  0xdf   :  { %s23_s9 = ssub.f32 0.0, %s41_s8 }
  0xe1   :  { %s24_s10 = smul.f32 0.030056147, %s23_s9 }
  0xe3   :  { %26 = sst [smem:[#allocation2]] %s24_s10 }
  0xe4   :  { %54 = shalt.err (!%p51_p2)
}
  0xe5   :  { %s57_s17 = smov [#allocation2]  }
  0xe6   :  { %34 = dma.smem_to_hbm %s57_s17, 16, %s84_s1, [#allocation3]  }
  0xe7   :  { %55 = dma.done.wait [#allocation3], 16  }
  0xe8   :  { %56 = vsyncadd [#allocation3], 4294967280 }
  0xe9   :  { %38 = sfence }
  0xea   :  { %39 = vsyncpa [#allocation3], 1 }

</bundles_post_ra>
